<compile_context>
chip_gen: v7x
topology: tpu7x:2x2x1
jax: 0.10.0
libtpu: 0.0.40
codegen_flags: <defaults>
</compile_context>

<pallas_src>
from functools import partial

import jax
import jax.numpy as jnp
from jax.experimental import pallas as pl
from jax.experimental.pallas import tpu as pltpu

_LANE = 128


def _round_up(n: int, m: int) -> int:
    return ((n + m - 1) // m) * m


def diabetes_kernel(xt_ref, w1t_ref, b1_ref, wd_ref, bd_ref, out_ref):
    """Fused forward for one batch tile, in transposed (feature-major) layout.

    xt_ref : (D_in, TB)      input tile, batch rows on the lane axis
    w1t_ref: (H_pad, D_in)   hidden weights (PyTorch (out,in) layout, padded to 128)
    b1_ref : (H_pad, 1)      hidden bias column
    wd_ref : (H_pad, 1)      folded output weights  w2[:,1] - w2[:,0]
    bd_ref : (1, 1)          folded output bias     b2[1]  - b2[0]
    out_ref: (2, TB)         [p0; p1] probabilities, lane-dense store
    """
    # Hidden layer on the MXU: (H_pad, D_in) @ (D_in, TB) -> (H_pad, TB)
    h = jnp.dot(w1t_ref[...], xt_ref[...], preferred_element_type=jnp.float32)
    h = jnp.maximum(h + b1_ref[...], 0.0)                       # bias + ReLU (VPU)

    # Output layer folded into a difference vector: logit_diff = l1 - l0, (1, TB).
    # (padded hidden rows are zero in both h and wd, so they contribute nothing)
    d = jnp.sum(h * wd_ref[...], axis=0, keepdims=True) + bd_ref[...]

    # softmax over 2 classes == sigmoid of the logit difference (exact, stable).
    p1 = 1.0 / (1.0 + jnp.exp(-d))                              # (1, TB)
    out_ref[...] = jnp.concatenate([1.0 - p1, p1], axis=0)      # (2, TB)


@partial(jax.jit, static_argnames=("block_rows",))
def diabetes_forward(x, w1, b1, w2, b2, *, block_rows=512):
    """Forward pass matching DiabetesNetwork.forward.

    x : (batch, d_in) float32
    w1: (d_in, hidden), b1: (1, hidden)   -- hidden layer, computes x @ w1 + b1
    w2: (hidden, 2),    b2: (1, 2)        -- output layer
    Returns (batch, 2) softmax probabilities.
    """
    batch, d_in = x.shape
    hidden = w1.shape[1]
    h_pad = _round_up(hidden, _LANE)

    # --- re-pack parameters (transposed, lane-padded, output layer folded) ---
    w1_t = jnp.zeros((h_pad, d_in), jnp.float32).at[:hidden, :].set(w1.T)
    b1_c = jnp.zeros((h_pad, 1), jnp.float32).at[:hidden, 0].set(b1[0])
    wd_c = jnp.zeros((h_pad, 1), jnp.float32).at[:hidden, 0].set(w2[:, 1] - w2[:, 0])
    bd_s = (b2[0, 1] - b2[0, 0]).reshape(1, 1).astype(jnp.float32)

    # --- batch tiling: rows on the lane axis, tile is a multiple of 128 ---
    tb = _round_up(min(block_rows, _round_up(batch, _LANE)), _LANE)
    batch_pad = _round_up(batch, tb)
    x_t = jnp.zeros((d_in, batch_pad), jnp.float32).at[:, :batch].set(x.T)

    grid = (batch_pad // tb,)
    out_t = pl.pallas_call(
        diabetes_kernel,
        out_shape=jax.ShapeDtypeStruct((2, batch_pad), jnp.float32),
        grid=grid,
        in_specs=[
            pl.BlockSpec((d_in, tb), lambda i: (0, i)),      # x^T tile (blocked on batch)
            pl.BlockSpec((h_pad, d_in), lambda i: (0, 0)),   # w1^T  (resident)
            pl.BlockSpec((h_pad, 1), lambda i: (0, 0)),      # b1    (resident)
            pl.BlockSpec((h_pad, 1), lambda i: (0, 0)),      # w2 diff (resident)
            pl.BlockSpec((1, 1), lambda i: (0, 0)),          # b2 diff (resident)
        ],
        out_specs=pl.BlockSpec((2, tb), lambda i: (0, i)),   # lane-dense output tile
        compiler_params=pltpu.CompilerParams(
            dimension_semantics=("parallel",)),              # shard batch across TCs (v7x)
    )(x_t, w1_t, b1_c, wd_c, bd_s)

    # Drop padded tail rows and return in PyTorch layout (batch, 2).
    return out_t[:, :batch].T


def init_params(key, input_signals, hidden_neurons, n_classes=2):
    """Deterministic init matching the shapes implied by DiabetesNetwork.__init__."""
    k1, k2, k3, k4 = jax.random.split(key, 4)
    bound1 = 1.0 / jnp.sqrt(input_signals)
    w1 = jax.random.uniform(k1, (input_signals, hidden_neurons), jnp.float32, -bound1, bound1)
    b1 = jax.random.uniform(k2, (1, hidden_neurons), jnp.float32, -bound1, bound1)
    bound2 = 1.0 / jnp.sqrt(hidden_neurons)
    w2 = jax.random.uniform(k3, (hidden_neurons, n_classes), jnp.float32, -bound2, bound2)
    b2 = jax.random.uniform(k4, (1, n_classes), jnp.float32, -bound2, bound2)
    return w1, b1, w2, b2


if __name__ == "__main__":
    key = jax.random.PRNGKey(0)
    batch, input_signals, hidden_neurons = 8, 8, 32

    k_x, k_p = jax.random.split(key)
    x = jax.random.normal(k_x, (batch, input_signals), jnp.float32)
    w1, b1, w2, b2 = init_params(k_p, input_signals, hidden_neurons)

    out = jax.block_until_ready(diabetes_forward(x, w1, b1, w2, b2))

    # Reference check against plain JAX (original softmax formulation).
    h_ref = jnp.maximum(x @ w1 + b1, 0.0)
    ref = jax.nn.softmax(h_ref @ w2 + b2, axis=1)
    assert out.shape == (batch, 2)
    assert jnp.allclose(out, ref, atol=1e-5, rtol=1e-5)
    assert jnp.allclose(jnp.sum(out, axis=1), 1.0, atol=1e-5)

    print("KERNEL_OK")
</pallas_src>

<mosaic_0001>
module attributes {stable_mosaic.version = 11 : i64} {
  func.func @diabetes_kernel(%arg0: i32, %arg1: memref<8x128xf32, #tpu.memory_space<vmem>>, %arg2: memref<128x8xf32, #tpu.memory_space<vmem>>, %arg3: memref<128x1xf32, #tpu.memory_space<vmem>>, %arg4: memref<128x1xf32, #tpu.memory_space<vmem>>, %arg5: memref<1x1xf32, #tpu.memory_space<vmem>>, %arg6: memref<2x128xf32, #tpu.memory_space<vmem>>) attributes {dimension_semantics = [#tpu.dimension_semantics<parallel>], iteration_bounds = array<i64: 1>, scalar_prefetch = 0 : i64, scratch_operands = 0 : i64, tpu.core_type = #tpu.core_type<tc>, window_params = [{transform_indices = @transform_0, window_bounds = array<i64: 8, 128>}, {pipeline_mode = #tpu.pipeline_mode<synchronous>, transform_indices = @transform_1, window_bounds = array<i64: 128, 8>}, {pipeline_mode = #tpu.pipeline_mode<synchronous>, transform_indices = @transform_2, window_bounds = array<i64: 128, 1>}, {pipeline_mode = #tpu.pipeline_mode<synchronous>, transform_indices = @transform_3, window_bounds = array<i64: 128, 1>}, {pipeline_mode = #tpu.pipeline_mode<synchronous>, transform_indices = @transform_4, window_bounds = array<i64: 1, 1>}, {transform_indices = @transform_5, window_bounds = array<i64: 2, 128>}]} {
    %c0 = arith.constant 0 : index
    %c0_0 = arith.constant 0 : index
    %0 = vector.load %arg2[%c0, %c0_0] : memref<128x8xf32, #tpu.memory_space<vmem>>, vector<128x8xf32>
    %c0_1 = arith.constant 0 : index
    %c0_2 = arith.constant 0 : index
    %1 = vector.load %arg1[%c0_1, %c0_2] : memref<8x128xf32, #tpu.memory_space<vmem>>, vector<8x128xf32>
    %cst = arith.constant dense<0.000000e+00> : vector<128x128xf32>
    %2 = tpu.matmul %0, %1, %cst {dimension_numbers = #tpu.dot_dimension_numbers<[1], [0], [0], [1], [0, 0, 1, 1], [], []>} : vector<128x8xf32>, vector<8x128xf32>, vector<128x128xf32> -> vector<128x128xf32>
    %c0_3 = arith.constant 0 : index
    %c0_4 = arith.constant 0 : index
    %3 = vector.load %arg3[%c0_3, %c0_4] : memref<128x1xf32, #tpu.memory_space<vmem>>, vector<128x1xf32>
    %4 = vector.broadcast %3 : vector<128x1xf32> to vector<128x128xf32>
    %5 = arith.addf %2, %4 : vector<128x128xf32>
    %cst_5 = arith.constant 0.000000e+00 : f32
    %6 = vector.broadcast %cst_5 : f32 to vector<128x128xf32>
    %7 = arith.maximumf %5, %6 : vector<128x128xf32>
    %c0_6 = arith.constant 0 : index
    %c0_7 = arith.constant 0 : index
    %8 = vector.load %arg4[%c0_6, %c0_7] : memref<128x1xf32, #tpu.memory_space<vmem>>, vector<128x1xf32>
    %9 = vector.broadcast %8 : vector<128x1xf32> to vector<128x128xf32>
    %10 = arith.mulf %7, %9 : vector<128x128xf32>
    %cst_8 = arith.constant dense<0.000000e+00> : vector<128xf32>
    %11 = vector.multi_reduction <add>, %10, %cst_8 [0] : vector<128x128xf32> to vector<128xf32>
    %12 = vector.shape_cast %11 : vector<128xf32> to vector<1x128xf32>
    %c0_9 = arith.constant 0 : index
    %c0_10 = arith.constant 0 : index
    %13 = vector.load %arg5[%c0_9, %c0_10] : memref<1x1xf32, #tpu.memory_space<vmem>>, vector<1x1xf32>
    %14 = vector.broadcast %13 : vector<1x1xf32> to vector<1x128xf32>
    %15 = arith.addf %12, %14 : vector<1x128xf32>
    %cst_11 = arith.constant 0.000000e+00 : f32
    %16 = vector.broadcast %cst_11 : f32 to vector<1x128xf32>
    %17 = arith.subf %16, %15 : vector<1x128xf32>
    %18 = math.exp %17 : vector<1x128xf32>
    %cst_12 = arith.constant 1.000000e+00 : f32
    %19 = vector.broadcast %cst_12 : f32 to vector<1x128xf32>
    %20 = arith.addf %19, %18 : vector<1x128xf32>
    %cst_13 = arith.constant 1.000000e+00 : f32
    %21 = vector.broadcast %cst_13 : f32 to vector<1x128xf32>
    %22 = arith.divf %21, %20 : vector<1x128xf32>
    %cst_14 = arith.constant 1.000000e+00 : f32
    %23 = vector.broadcast %cst_14 : f32 to vector<1x128xf32>
    %24 = arith.subf %23, %22 : vector<1x128xf32>
    %25 = tpu.concatenate %24, %22 in 0 : vector<1x128xf32>, vector<1x128xf32> -> vector<2x128xf32>
    %c0_15 = arith.constant 0 : index
    %c0_16 = arith.constant 0 : index
    %26 = vector.load %arg6[%c0_15, %c0_16] : memref<2x128xf32, #tpu.memory_space<vmem>>, vector<2x128xf32>
    tpu.vector_store %arg6[%c0_15, %c0_16], %25 {strides = array<i32>} : memref<2x128xf32, #tpu.memory_space<vmem>>, vector<2x128xf32>,
    return
  }
  func.func @transform_0(%arg0: i32) -> (i32, i32) {
    %c0_i32 = arith.constant 0 : i32
    %c0_i32_0 = arith.constant 0 : i32
    return %c0_i32, %arg0 : i32, i32
  }
  func.func @transform_1(%arg0: i32) -> (i32, i32) {
    %c0_i32 = arith.constant 0 : i32
    %c0_i32_0 = arith.constant 0 : i32
    %c0_i32_1 = arith.constant 0 : i32
    return %c0_i32, %c0_i32_0 : i32, i32
  }
  func.func @transform_2(%arg0: i32) -> (i32, i32) {
    %c0_i32 = arith.constant 0 : i32
    %c0_i32_0 = arith.constant 0 : i32
    %c0_i32_1 = arith.constant 0 : i32
    return %c0_i32, %c0_i32_0 : i32, i32
  }
  func.func @transform_3(%arg0: i32) -> (i32, i32) {
    %c0_i32 = arith.constant 0 : i32
    %c0_i32_0 = arith.constant 0 : i32
    %c0_i32_1 = arith.constant 0 : i32
    return %c0_i32, %c0_i32_0 : i32, i32
  }
  func.func @transform_4(%arg0: i32) -> (i32, i32) {
    %c0_i32 = arith.constant 0 : i32
    %c0_i32_0 = arith.constant 0 : i32
    %c0_i32_1 = arith.constant 0 : i32
    return %c0_i32, %c0_i32_0 : i32, i32
  }
  func.func @transform_5(%arg0: i32) -> (i32, i32) {
    %c0_i32 = arith.constant 0 : i32
    %c0_i32_0 = arith.constant 0 : i32
    return %c0_i32, %arg0 : i32, i32
  }
}

</mosaic_0001>

<bundles_post_ra>
// kernel: diabetes_forward.1
= control target key start
LH: loop header
LB: loop body
LE: loop exit
PB: predicated region body
PF: predicated region fallthrough
CT: control target
= control target key end

     0   :  { %v571_v0 = vmov 0   ;;  %vm135_vm0 = vcmask 64512   ;;  %vm496_vm1 = vcmask 1040384   ;;  %s771_s2 = inlined_call_operand.vmem [shape: f32[128,1], index: 2, kind: input, shape index: {}]   ;;  %s772_s0 = inlined_call_operand.vmem [shape: f32[8,128], index: 0, kind: input, shape index: {}]   ;;  %s773_s1 = inlined_call_operand.vmem [shape: f32[128,8], index: 1, kind: input, shape index: {}]   ;;  %s774_s4 = inlined_call_operand.<no memory space> [shape: f32[1,1], index: 4, kind: input, shape index: {}]   ;;  %s775_s3 = inlined_call_operand.vmem [shape: f32[128,1], index: 3, kind: input, shape index: {}]   ;;  %s776_s5 = inlined_call_operand.vmem [shape: f32[2,128], index: 5, kind: output, shape index: {}]  }
   0x1   :  { %565 = vset.pattern.permute.xlu0 %v571_v0  ;;  %566 = vset.pattern.permute.xlu1 %v571_v0  ;;  %v39_v1 = vld [vmem:[%s771_s2] sm:$0xff]  ;;  %v41_v3 = vld [vmem:[%s771_s2 + $0x10] sm:$0xff]  ;;  %v10_v4 = vstv %s774_s4  ;;  %v23_v7 = vld [vmem:[%s773_s1 + $0x8] sm:$0xff] }
   0x2   :  { %v38_v2 = vld [vmem:[%s772_s0] sm:$0xff]  ;;  %57 = vperm.xlu0 %565, %v39_v1   ;;  %11 = vst [vmem:[#allocation2] sm:$0x1] %v10_v4  ;;  %67 = vperm.xlu1 %566, %v41_v3   ;;  %v31_v8 = vld [vmem:[%s773_s1 + $0x48] sm:$0xff]  ;;  %v42_v10 = vld [vmem:[%s771_s2 + $0x18] sm:$0xff] }
   0x3   :  { %536 = vmatprep.subr.mxu0 %v38_v2  ;;  %v22_v5 = vld [vmem:[%s773_s1] sm:$0xff]  ;;  %562 = vmatprep.subr.mxu1 %v38_v2  ;;  %v40_v9 = vld [vmem:[%s771_s2 + $0x8] sm:$0xff]  ;;  %v24_v11 = vld [vmem:[%s773_s1 + $0x10] sm:$0xff] }
   0x4   :  { %v30_v6 = vld [vmem:[%s773_s1 + $0x40] sm:$0xff]  ;;  %537 = vmatpush3.msra.mxu0 %v38_v2  ;;  %563 = vmatpush3.msra.mxu1 %v38_v2  ;;  %v32_v12 = vld [vmem:[%s773_s1 + $0x50] sm:$0xff]  ;;  %v25_v13 = vld [vmem:[%s773_s1 + $0x18] sm:$0xff] }
   0x5   :  { %538 = vmatprep.mubr.msk.f32.mxu0 %vm135_vm0, %v22_v5  ;;  %550 = vmatprep.mubr.msk.f32.mxu1 %vm135_vm0, %v30_v6  ;;  %v33_v14 = vld [vmem:[%s773_s1 + $0x58] sm:$0xff]  ;;  %v345_v15 = vld [vmem:[%s775_s3] sm:$0xff]  ;;  %v346_v16 = vld [vmem:[%s775_s3 + $0x8] sm:$0xff] }
   0x6   :  { %539 = vmatmul.mubr.msk.f32.vlgmr.msra.gmra.mrb[0].mxu0 %vm135_vm0, %v23_v7  ;;  %551 = vmatmul.mubr.msk.f32.vlgmr.msra.gmra.mrb[0].mxu1 %vm135_vm0, %v31_v8  ;;  %v26_v17 = vld [vmem:[%s773_s1 + $0x20] sm:$0xff]  ;;  %v27_v19 = vld [vmem:[%s773_s1 + $0x28] sm:$0xff]  ;;  %v347_v22 = vld [vmem:[%s775_s3 + $0x10] sm:$0xff] }
   0x7   :  { %62 = vperm.xlu0 %565, %v40_v9   ;;  %72 = vperm.xlu1 %566, %v42_v10   ;;  %v34_v18 = vld [vmem:[%s773_s1 + $0x60] sm:$0xff]  ;;  %v35_v20 = vld [vmem:[%s773_s1 + $0x68] sm:$0xff]  ;;  %v28_v23 = vld [vmem:[%s773_s1 + $0x30] sm:$0xff] }
   0x8   :  { %541 = vmatprep.mubr.msk.f32.mxu0 %vm135_vm0, %v24_v11  ;;  %553 = vmatprep.mubr.msk.f32.mxu1 %vm135_vm0, %v32_v12  ;;  %v43_v21 = vld [vmem:[%s771_s2 + $0x20] sm:$0xff]  ;;  %v36_v24 = vld [vmem:[%s773_s1 + $0x70] sm:$0xff]  ;;  %v29_v25 = vld [vmem:[%s773_s1 + $0x38] sm:$0xff] }
   0x9   :  { %v37_v26 = vld [vmem:[%s773_s1 + $0x78] sm:$0xff]  ;;  %v44_v27 = vld [vmem:[%s771_s2 + $0x28] sm:$0xff]  ;;  %v45_v29 = vld [vmem:[%s771_s2 + $0x30] sm:$0xff] }
   0xa   :  { %542 = vmatmul.mubr.msk.f32.gmra.mrb[2].mxu0 %vm135_vm0, %v25_v13  ;;  %554 = vmatmul.mubr.msk.f32.gmra.mrb[2].mxu1 %vm135_vm0, %v33_v14  ;;  %v348_v28 = vld [vmem:[%s775_s3 + $0x18] sm:$0xff]  ;;  %v349_v30 = vld [vmem:[%s775_s3 + $0x20] sm:$0xff]  ;;  %v350_v32 = vld [vmem:[%s775_s3 + $0x28] sm:$0xff] }
   0xb   :  { %363 = vperm.xlu0 %565, %v345_v15   ;;  %368 = vperm.xlu1 %566, %v346_v16   ;;  %v46_v31 = vld [vmem:[%s771_s2 + $0x38] sm:$0xff]  ;;  %v47_v33 = vld [vmem:[%s771_s2 + $0x40] sm:$0xff]  ;;  %v351_v34 = vld [vmem:[%s775_s3 + $0x30] sm:$0xff] }
   0xc   :  { %544 = vmatprep.mubr.msk.f32.mxu0 %vm135_vm0, %v26_v17  ;;  %556 = vmatprep.mubr.msk.f32.mxu1 %vm135_vm0, %v34_v18  ;;  %v48_v35 = vld [vmem:[%s771_s2 + $0x48] sm:$0xff]  ;;  %v352_v36 = vld [vmem:[%s775_s3 + $0x38] sm:$0xff]  ;;  %v49_v37 = vld [vmem:[%s771_s2 + $0x50] sm:$0xff] }
   0xd   :  { %v353_v38 = vld [vmem:[%s775_s3 + $0x40] sm:$0xff]  ;;  %v50_v39 = vld [vmem:[%s771_s2 + $0x58] sm:$0xff]  ;;  %v354_v40 = vld [vmem:[%s775_s3 + $0x48] sm:$0xff] }
   0xe   :  { %545 = vmatmul.mubr.msk.f32.gmra.mrb[4].mxu0 %vm135_vm0, %v27_v19  ;;  %557 = vmatmul.mubr.msk.f32.gmra.mrb[4].mxu1 %vm135_vm0, %v35_v20  ;;  %v51_v41 = vld [vmem:[%s771_s2 + $0x60] sm:$0xff]  ;;  %v355_v42 = vld [vmem:[%s775_s3 + $0x50] sm:$0xff]  ;;  %v52_v43 = vld [vmem:[%s771_s2 + $0x68] sm:$0xff] }
   0xf   :  { %77 = vperm.xlu0 %565, %v43_v21   ;;  %373 = vperm.xlu1 %566, %v347_v22   ;;  %v356_v44 = vld [vmem:[%s775_s3 + $0x58] sm:$0xff]  ;;  %v53_v45 = vld [vmem:[%s771_s2 + $0x70] sm:$0xff]  ;;  %v357_v46 = vld [vmem:[%s775_s3 + $0x60] sm:$0xff] }
  0x10   :  { %547 = vmatprep.mubr.msk.f32.mxu0 %vm135_vm0, %v28_v23  ;;  %559 = vmatprep.mubr.msk.f32.mxu1 %vm135_vm0, %v36_v24  ;;  %v54_v47 = vld [vmem:[%s771_s2 + $0x78] sm:$0xff]  ;;  %v358_v48 = vld [vmem:[%s775_s3 + $0x68] sm:$0xff]  ;;  %v359_v49 = vld [vmem:[%s775_s3 + $0x70] sm:$0xff] }
  0x11   :  { %v360_v50 = vld [vmem:[%s775_s3 + $0x78] sm:$0xff]  ;;  %v478_v51 = vld [vmem:[#allocation2] sm:$0x1] }
  0x12   :  { %548 = vmatmul.mubr.msk.f32.gmra.mrb[6].mxu0 %vm135_vm0, %v29_v25  ;;  %560 = vmatmul.mubr.msk.f32.gmra.mrb[6].mxu1 %vm135_vm0, %v37_v26 }
  0x13   :  { %82 = vperm.xlu0 %565, %v44_v27   ;;  %378 = vperm.xlu1 %566, %v348_v28  }
  0x17   :  { %87 = vperm.xlu0 %565, %v45_v29   ;;  %383 = vperm.xlu1 %566, %v349_v30  }
  0x1b   :  { %92 = vperm.xlu0 %565, %v46_v31   ;;  %388 = vperm.xlu1 %566, %v350_v32  }
  0x1f   :  { %97 = vperm.xlu0 %565, %v47_v33   ;;  %393 = vperm.xlu1 %566, %v351_v34  }
  0x23   :  { %102 = vperm.xlu0 %565, %v48_v35   ;;  %398 = vperm.xlu1 %566, %v352_v36  }
  0x27   :  { %107 = vperm.xlu0 %565, %v49_v37   ;;  %403 = vperm.xlu1 %566, %v353_v38  }
  0x2b   :  { %112 = vperm.xlu0 %565, %v50_v39   ;;  %408 = vperm.xlu1 %566, %v354_v40  }
  0x2f   :  { %117 = vperm.xlu0 %565, %v51_v41   ;;  %413 = vperm.xlu1 %566, %v355_v42  }
  0x33   :  { %122 = vperm.xlu0 %565, %v52_v43   ;;  %418 = vperm.xlu1 %566, %v356_v44  }
  0x37   :  { %127 = vperm.xlu0 %565, %v53_v45   ;;  %423 = vperm.xlu1 %566, %v357_v46  }
  0x3b   :  { %132 = vperm.xlu0 %565, %v54_v47   ;;  %428 = vperm.xlu1 %566, %v358_v48  }
  0x3f   :  { %433 = vperm.xlu0 %565, %v359_v49   ;;  %438 = vperm.xlu1 %566, %v360_v50  }
  0x43   :  { %481 = vperm.xlu0 %565, %v478_v51  }
  0x81   :  { %v58_v52 = vpop.permute.xlu0 %57  ;;  %v68_v53 = vpop.permute.xlu1 %67 }
  0x86   :  { %v63_v54 = vpop.permute.xlu0 %62  ;;  %v73_v55 = vpop.permute.xlu1 %72 }
  0x8a   :  { %v364_v56 = vpop.permute.xlu0 %363  ;;  %v369_v57 = vpop.permute.xlu1 %368 }
  0x8e   :  { %v78_v58 = vpop.permute.xlu0 %77  ;;  %v374_v59 = vpop.permute.xlu1 %373 }
  0x92   :  { %v83_v60 = vpop.permute.xlu0 %82  ;;  %v379_v61 = vpop.permute.xlu1 %378 }
  0x96   :  { %v88_v62 = vpop.permute.xlu0 %87  ;;  %v384_v63 = vpop.permute.xlu1 %383 }
  0x9a   :  { %v93_v0 = vpop.permute.xlu0 %92  ;;  %v389_v1 = vpop.permute.xlu1 %388 }
  0x9e   :  { %v98_v2 = vpop.permute.xlu0 %97  ;;  %v394_v3 = vpop.permute.xlu1 %393 }
  0xa2   :  { %v103_v4 = vpop.permute.xlu0 %102  ;;  %v399_v5 = vpop.permute.xlu1 %398 }
  0xa6   :  { %v108_v6 = vpop.permute.xlu0 %107  ;;  %v404_v7 = vpop.permute.xlu1 %403 }
  0xaa   :  { %v113_v8 = vpop.permute.xlu0 %112  ;;  %v409_v15 = vpop.permute.xlu1 %408 }
  0xae   :  { %v118_v26 = vpop.permute.xlu0 %117  ;;  %v414_v37 = vpop.permute.xlu1 %413 }
  0xb2   :  { %v123_v51 = vpop.permute.xlu0 %122 }
  0xd9   :  { %v540_v9 = vpop.f32.mrb[0].mxu0  ;;  %v552_v10 = vpop.f32.mrb[0].mxu1 }
  0xda   :  { %v256_v11 = vadd.f32 %v540_v9, %v63_v54  ;;  %v250_v12 = vpop.f32.mrb[1].mxu0  ;;  %v290_v13 = vpop.f32.mrb[1].mxu1 }
  0xdb   :  { %v251_v14 = vadd.f32 %v250_v12, %v58_v52  ;;  %v291_v47 = vadd.f32 %v290_v13, %v98_v2  ;;  %v296_v52 = vadd.f32 %v552_v10, %v103_v4 }
  0xdc   :  { %v330_v16 = vmax.f32 %v256_v11, 0.0 }
  0xdd   :  { %v329_v17 = vmax.f32 %v251_v14, 0.0  ;;  %v543_v18 = vpop.f32.mrb[2].mxu0  ;;  %v555_v19 = vpop.f32.mrb[2].mxu1  ;;  %v338_v9 = vmax.f32 %v296_v52, 0.0 }
  0xde   :  { %v442_v20 = vmul.f32 %v369_v57, %v330_v16  ;;  %v266_v21 = vadd.f32 %v543_v18, %v73_v55  ;;  %v260_v22 = vpop.f32.mrb[3].mxu0  ;;  %v300_v23 = vpop.f32.mrb[3].mxu1  ;;  %v306_v11 = vadd.f32 %v555_v19, %v113_v8 }
  0xdf   :  { %v441_v24 = vmul.f32 %v364_v56, %v329_v17  ;;  %v261_v25 = vadd.f32 %v260_v22, %v68_v53  ;;  %v419_v57 = vpop.permute.xlu1 %418  ;;  %v128_v14 = vpop.permute.xlu0 %127  ;;  %v450_v4 = vmul.f32 %v409_v15, %v338_v9 }
  0xe0   :  { %v332_v28 = vmax.f32 %v266_v21, 0.0 }
  0xe1   :  { %v457_v27 = vadd.f32 %v442_v20, %v441_v24  ;;  %v331_v29 = vmax.f32 %v261_v25, 0.0  ;;  %v546_v30 = vpop.f32.mrb[4].mxu0  ;;  %v558_v31 = vpop.f32.mrb[4].mxu1 }
  0xe2   :  { %v276_v32 = vadd.f32 %v546_v30, %v83_v60  ;;  %v270_v33 = vpop.f32.mrb[5].mxu0  ;;  %v310_v34 = vpop.f32.mrb[5].mxu1  ;;  %v444_v38 = vmul.f32 %v379_v61, %v332_v28  ;;  %v316_v10 = vadd.f32 %v558_v31, %v123_v51 }
  0xe3   :  { %v443_v35 = vmul.f32 %v374_v59, %v331_v29  ;;  %v271_v36 = vadd.f32 %v270_v33, %v78_v58  ;;  %v337_v58 = vmax.f32 %v291_v47, 0.0  ;;  %v301_v59 = vadd.f32 %v300_v23, %v108_v6  ;;  %v424_v16 = vpop.permute.xlu1 %423 }
  0xe4   :  { %v334_v40 = vmax.f32 %v276_v32, 0.0  ;;  %v311_v13 = vadd.f32 %v310_v34, %v118_v26  ;;  %v342_v23 = vmax.f32 %v316_v10, 0.0  ;;  %v484_v34 = vlaneseq }
  0xe5   :  { %v458_v39 = vadd.f32 %v457_v27, %v443_v35  ;;  %v333_v41 = vmax.f32 %v271_v36, 0.0  ;;  %v549_v42 = vpop.f32.mrb[6].mxu0  ;;  %v561_v43 = vpop.f32.mrb[6].mxu1  ;;  %v449_v2 = vmul.f32 %v404_v7, %v337_v58 }
  0xe6   :  { %v286_v44 = vadd.f32 %v549_v42, %v93_v0  ;;  %v280_v45 = vpop.f32.mrb[7].mxu0  ;;  %v320_v46 = vpop.f32.mrb[7].mxu1  ;;  %v446_v53 = vmul.f32 %v389_v1, %v334_v40  ;;  %v340_v1 = vmax.f32 %v306_v11, 0.0  ;;  %v341_v20 = vmax.f32 %v311_v13, 0.0 }
  0xe7   :  { %v445_v48 = vmul.f32 %v384_v63, %v333_v41  ;;  %v459_v49 = vadd.f32 %v458_v39, %v444_v38  ;;  %v281_v50 = vadd.f32 %v280_v45, %v88_v62  ;;  %v339_v63 = vmax.f32 %v301_v59, 0.0  ;;  %v429_v19 = vpop.permute.xlu1 %428 }
  0xe8   :  { %v336_v55 = vmax.f32 %v286_v44, 0.0  ;;  %v321_v6 = vadd.f32 %v320_v46, %v128_v14  ;;  %v452_v22 = vmul.f32 %v419_v57, %v340_v1  ;;  %v453_v24 = vmul.f32 %v424_v16, %v341_v20 }
  0xe9   :  { %v460_v54 = vadd.f32 %v459_v49, %v445_v48  ;;  %v335_v56 = vmax.f32 %v281_v50, 0.0  ;;  %v451_v18 = vmul.f32 %v414_v37, %v339_v63  ;;  %v454_v26 = vmul.f32 %v429_v19, %v342_v23 }
  0xea   :  { %v448_v0 = vmul.f32 %v399_v5, %v336_v55  ;;  %v343_v7 = vmax.f32 %v321_v6, 0.0  ;;  %v485_v37 = vshrl.u32 %v484_v34, 7 }
  0xeb   :  { %v447_v60 = vmul.f32 %v394_v3, %v335_v56  ;;  %v461_v61 = vadd.f32 %v460_v54, %v446_v53  ;;  %v133_v3 = vpop.permute.xlu0 %132  ;;  %v439_v31 = vpop.permute.xlu1 %438 }
  0xec   :  { %v326_v8 = vadd.f32 %v561_v43, %v133_v3  ;;  %v486_v40 = vsub.s32 0, %v485_v37 }
  0xed   :  { %v462_v12 = vadd.f32 %v461_v61, %v447_v60 }
  0xee   :  { %v344_v27 = vmax.f32 %v326_v8, 0.0 }
  0xef   :  { %v463_v62 = vadd.f32 %v462_v12, %v448_v0  ;;  %v434_v15 = vpop.permute.xlu0 %433 }
  0xf0   :  { %v455_v29 = vmul.f32 %v434_v15, %v343_v7  ;;  %v456_v32 = vmul.f32 %v439_v31, %v344_v27 }
  0xf1   :  { %v464_v17 = vadd.f32 %v463_v62, %v449_v2 }
  0xf3   :  { %v465_v21 = vadd.f32 %v464_v17, %v450_v4  ;;  %v482_v42 = vpop.permute.xlu0 %481 }
  0xf4   :  { %v487_v44 = vrot.slane %v482_v42, %v486_v40 }
  0xf5   :  { %v466_v5 = vadd.f32 %v465_v21, %v451_v18 }
  0xf7   :  { %v467_v25 = vadd.f32 %v466_v5, %v452_v22 }
  0xf9   :  { %v468_v28 = vadd.f32 %v467_v25, %v453_v24 }
  0xfb   :  { %v469_v30 = vadd.f32 %v468_v28, %v454_v26 }
  0xfd   :  { %v470_v33 = vadd.f32 %v469_v30, %v455_v29 }
  0xff   :  { %v471_v35 = vadd.f32 %v470_v33, %v456_v32 }
 0x101   :  { %v472_v36 = vrot.slane %v471_v35, 4 }
 0x103   :  { %v473_v38 = vadd.f32 %v472_v36, %v471_v35 }
 0x105   :  { %v474_v39 = vrot.slane %v473_v38, 2 }
 0x107   :  { %v475_v41 = vadd.f32 %v474_v39, %v473_v38 }
 0x109   :  { %v476_v43 = vrot.slane %v475_v41, 1 }
 0x10b   :  { %v477_v45 = vadd.f32 %v476_v43, %v475_v41 }
 0x10d   :  { %v488_v46 = vadd.f32 %v487_v44, %v477_v45 }
 0x10f   :  { %v489_v47 = vsub.f32 0.0, %v488_v46 }
 0x111   :  { %v490_v48 = vmul.f32 1.442695, %v489_v47 }
 0x113   :  { %567 = vpow2.f32 %v490_v48 }
 0x11d   :  { %v568_v49 = vpop.eup %567 }
 0x11e   :  { %v492_v50 = vadd.f32 1.0, %v568_v49 }
 0x120   :  { %569 = vrcp.f32 %v492_v50 }
 0x12a   :  { %v570_v51 = vpop.eup %569 }
 0x12b   :  { %v495_v52 = vsub.f32 1.0, %v570_v51 }
 0x12d   :  { %v497_v53 = vsel %vm496_vm1, %v495_v52, %v570_v51 }
 0x12e   :  { %498 = vst [vmem:[%s776_s5] sm:$0x3] %v497_v53 }

</bundles_post_ra>
